<compile_context>
chip_gen: v7x
topology: tpu7x:2x2x1
jax: 0.10.0
libtpu: 0.0.40
codegen_flags: <defaults>
</compile_context>

<pallas_src>
import functools

import jax
import jax.numpy as jnp
from jax import lax
from jax.experimental import pallas as pl
from jax.experimental.pallas import tpu as pltpu


def _deepnorm_kernel(x_ref, gx_ref, gb_ref, o_ref, *, alpha, eps):
    # residual add + LayerNorm over the last axis (biased variance, like torch)
    y = x_ref[...].astype(jnp.float32) + alpha * gx_ref[...].astype(jnp.float32)
    inv_h = 1.0 / y.shape[-1]
    # one-pass statistics: a single sweep feeds both reductions
    s1 = jnp.sum(y, axis=-1, keepdims=True)
    s2 = jnp.sum(y * y, axis=-1, keepdims=True)
    mean = s1 * inv_h
    var = jnp.maximum(s2 * inv_h - mean * mean, 0.0)
    gamma = gb_ref[0:1, :]                       # (1, H) f32, resident
    beta = gb_ref[1:2, :]                        # (1, H) f32, resident
    scale = lax.rsqrt(var + eps) * gamma         # gamma folded into the factor
    o_ref[...] = ((y - mean) * scale + beta).astype(o_ref.dtype)


def _round_up(a: int, b: int) -> int:
    return ((a + b - 1) // b) * b


def _vmem_capacity_bytes() -> int:
    """Physical VMEM per TensorCore, with a conservative (v7x) fallback."""
    try:
        info = pltpu.get_tpu_info()
        cap = int(getattr(info, "vmem_capacity_bytes", 0))
        if cap > 0:
            return cap
    except Exception:
        pass
    return 64 * 1024 * 1024


def _choose_row_tile(R: int, H: int, itemsize: int, vmem_capacity: int) -> int:
    """Row tile targeting the 1-8 MiB mem-bound plateau, VMEM-safe per chip gen."""
    # sublane packing: 8 rows for 32-bit, 16 for 16-bit (bf16), 32 for 8-bit
    mult = max(8, 32 // max(1, itemsize))
    bytes_per_row = max(1, H * itemsize)

    # VMEM cost of one block: 3 streams x 2 pipeline buffers in the I/O dtype
    # plus ~3 full-tile f32 temporaries inside the body.
    per_block_factor = 6 + 3 * max(1, 4 // max(1, itemsize))
    budget = int(0.7 * vmem_capacity) - (4 << 20)
    target_block_bytes = max(1 << 20, min(budget // per_block_factor, 8 << 20))

    rt = max(mult, (target_block_bytes // bytes_per_row) // mult * mult)

    # Keep a few grid steps for pipelining (and to feed both v7x TCs), but
    # never shrink a block below ~1 MiB to do it: the measured tile curve is
    # ~29% of roofline at tiny tiles vs ~85%+ at 1-4 MiB, and each grid step
    # carries ~0.35us of fixed overhead (pure loss on single-TC v5e/v6e).
    min_steps = 4
    min_block_rows = max(mult, ((1 << 20) // bytes_per_row) // mult * mult)
    if R >= min_steps * min_block_rows:
        cap = max(min_block_rows, _round_up(pl.cdiv(R, min_steps), mult))
        rt = min(rt, cap)

    # never (much) bigger than the problem itself; partial tail block is masked
    rt = min(rt, max(mult, (R // mult) * mult))
    return max(mult, rt)


def _vmem_limit_bytes(row_tile: int, H: int, itemsize: int, vmem_capacity: int) -> int:
    """Derive the scoped-VMEM limit from the actual block footprint."""
    block = row_tile * H * itemsize
    f32_temps = 3 * row_tile * H * 4
    need = 6 * block + f32_temps + 4 * H * 4 + (4 << 20)
    # never below the default scoped limit; keep >=25% physical headroom (v7x).
    return int(min(max(need, 32 << 20), (vmem_capacity // 4) * 3))


def deepnorm(x, gx, gamma, beta, *, alpha, eps=1e-5, row_tile=None):
    """x, gx: (..., H); gamma, beta: (H,). Returns layernorm(x + alpha*gx)."""
    assert x.shape == gx.shape
    H = x.shape[-1]
    orig_shape = x.shape
    x2 = x.reshape(-1, H)
    gx2 = gx.reshape(-1, H)
    R = x2.shape[0]

    itemsize = jnp.dtype(x.dtype).itemsize
    vmem_cap = _vmem_capacity_bytes()
    if row_tile is None:
        row_tile = _choose_row_tile(R, H, itemsize, vmem_cap)

    # gamma/beta pre-cast to f32 and stacked: one tiny resident (2, H) block.
    gb = jnp.stack([gamma.reshape(H), beta.reshape(H)], axis=0).astype(jnp.float32)

    kernel = functools.partial(_deepnorm_kernel, alpha=float(alpha), eps=float(eps))

    # No padding: Pallas masks the stores of the partial last block; over-read
    # rows never contaminate others because normalization is strictly row-wise.
    grid = (pl.cdiv(R, row_tile),)

    out = pl.pallas_call(
        kernel,
        out_shape=jax.ShapeDtypeStruct((R, H), x.dtype),
        grid_spec=pltpu.PrefetchScalarGridSpec(
            num_scalar_prefetch=0,
            grid=grid,
            in_specs=[
                pl.BlockSpec((row_tile, H), lambda i: (i, 0)),
                pl.BlockSpec((row_tile, H), lambda i: (i, 0)),
                pl.BlockSpec((2, H), lambda i: (0, 0)),
            ],
            out_specs=pl.BlockSpec((row_tile, H), lambda i: (i, 0)),
        ),
        compiler_params=pltpu.CompilerParams(
            dimension_semantics=("parallel",),
            vmem_limit_bytes=_vmem_limit_bytes(row_tile, H, itemsize, vmem_cap),
        ),
    )(x2, gx2, gb)

    return out.reshape(orig_shape)


def _reference(x, gx, gamma, beta, alpha, eps):
    y = x.astype(jnp.float32) + alpha * gx.astype(jnp.float32)
    mean = jnp.mean(y, axis=-1, keepdims=True)
    var = jnp.mean((y - mean) ** 2, axis=-1, keepdims=True)
    return ((y - mean) / jnp.sqrt(var + eps)) * gamma + beta


if __name__ == "__main__":
    # DeepNorm(alpha, normalized_shape=hidden)
    batch, seq, hidden = 2, 8, 128   # lane-dense hidden (multiple of 128)
    alpha = 2.0
    eps = 1e-5

    key = jax.random.PRNGKey(0)
    kx, kg = jax.random.split(key)
    x = jax.random.normal(kx, (batch, seq, hidden), dtype=jnp.float32)
    gx = jax.random.normal(kg, (batch, seq, hidden), dtype=jnp.float32)

    # LayerNorm affine params, deterministic init (same as torch default).
    gamma = jnp.ones((hidden,), dtype=jnp.float32)
    beta = jnp.zeros((hidden,), dtype=jnp.float32)

    out = deepnorm(x, gx, gamma, beta, alpha=alpha, eps=eps)
    out = jax.block_until_ready(out)

    ref = _reference(x, gx, gamma, beta, alpha, eps)
    assert out.shape == x.shape
    assert jnp.allclose(out, ref, atol=1e-5, rtol=1e-5), "mismatch vs reference"

    # Also exercise a non-tile-divisible row count (masked tail path) + bf16 I/O.
    x3 = jax.random.normal(kx, (3, 7, hidden), dtype=jnp.bfloat16)
    gx3 = jax.random.normal(kg, (3, 7, hidden), dtype=jnp.bfloat16)
    out3 = jax.block_until_ready(
        deepnorm(x3, gx3, gamma, beta, alpha=alpha, eps=eps)
    )
    ref3 = _reference(x3, gx3, gamma, beta, alpha, eps)
    assert jnp.allclose(out3.astype(jnp.float32), ref3, atol=2e-2, rtol=2e-2)

    print("KERNEL_OK")
</pallas_src>

<mosaic_0001>
module attributes {stable_mosaic.version = 11 : i64} {
  func.func @_deepnorm_kernel(%arg0: i32, %arg1: memref<16x128xf32, #tpu.memory_space<vmem>>, %arg2: memref<16x128xf32, #tpu.memory_space<vmem>>, %arg3: memref<2x128xf32, #tpu.memory_space<vmem>>, %arg4: memref<16x128xf32, #tpu.memory_space<vmem>>) attributes {dimension_semantics = [#tpu.dimension_semantics<parallel>], iteration_bounds = array<i64: 1>, scalar_prefetch = 0 : i64, scratch_operands = 0 : i64, tpu.core_type = #tpu.core_type<tc>, window_params = [{transform_indices = @transform_0, window_bounds = array<i64: 16, 128>}, {transform_indices = @transform_1, window_bounds = array<i64: 16, 128>}, {pipeline_mode = #tpu.pipeline_mode<synchronous>, transform_indices = @transform_2, window_bounds = array<i64: 2, 128>}, {transform_indices = @transform_3, window_bounds = array<i64: 16, 128>}]} {
    %c0 = arith.constant 0 : index
    %c0_0 = arith.constant 0 : index
    %0 = vector.load %arg1[%c0, %c0_0] : memref<16x128xf32, #tpu.memory_space<vmem>>, vector<16x128xf32>
    %c0_1 = arith.constant 0 : index
    %c0_2 = arith.constant 0 : index
    %1 = vector.load %arg2[%c0_1, %c0_2] : memref<16x128xf32, #tpu.memory_space<vmem>>, vector<16x128xf32>
    %cst = arith.constant 2.000000e+00 : f32
    %2 = vector.broadcast %cst : f32 to vector<16x128xf32>
    %3 = arith.mulf %2, %1 : vector<16x128xf32>
    %4 = arith.addf %0, %3 : vector<16x128xf32>
    %cst_3 = arith.constant dense<0.000000e+00> : vector<16xf32>
    %5 = vector.multi_reduction <add>, %4, %cst_3 [1] : vector<16x128xf32> to vector<16xf32>
    %6 = vector.shape_cast %5 : vector<16xf32> to vector<16x1xf32>
    %7 = arith.mulf %4, %4 : vector<16x128xf32>
    %cst_4 = arith.constant dense<0.000000e+00> : vector<16xf32>
    %8 = vector.multi_reduction <add>, %7, %cst_4 [1] : vector<16x128xf32> to vector<16xf32>
    %9 = vector.shape_cast %8 : vector<16xf32> to vector<16x1xf32>
    %cst_5 = arith.constant 7.812500e-03 : f32
    %10 = vector.broadcast %cst_5 : f32 to vector<16x1xf32>
    %11 = arith.mulf %6, %10 : vector<16x1xf32>
    %cst_6 = arith.constant 7.812500e-03 : f32
    %12 = vector.broadcast %cst_6 : f32 to vector<16x1xf32>
    %13 = arith.mulf %9, %12 : vector<16x1xf32>
    %14 = arith.mulf %11, %11 : vector<16x1xf32>
    %15 = arith.subf %13, %14 : vector<16x1xf32>
    %cst_7 = arith.constant 0.000000e+00 : f32
    %16 = vector.broadcast %cst_7 : f32 to vector<16x1xf32>
    %17 = arith.maximumf %15, %16 : vector<16x1xf32>
    %c0_8 = arith.constant 0 : index
    %c0_9 = arith.constant 0 : index
    %18 = vector.load %arg3[%c0_8, %c0_9] : memref<2x128xf32, #tpu.memory_space<vmem>>, vector<1x128xf32>
    %c1 = arith.constant 1 : index
    %c0_10 = arith.constant 0 : index
    %19 = vector.load %arg3[%c1, %c0_10] : memref<2x128xf32, #tpu.memory_space<vmem>>, vector<1x128xf32>
    %cst_11 = arith.constant 9.99999974E-6 : f32
    %20 = vector.broadcast %cst_11 : f32 to vector<16x1xf32>
    %21 = arith.addf %17, %20 : vector<16x1xf32>
    %22 = math.rsqrt %21 : vector<16x1xf32>
    %23 = vector.broadcast %22 : vector<16x1xf32> to vector<16x128xf32>
    %24 = vector.broadcast %18 : vector<1x128xf32> to vector<16x128xf32>
    %25 = arith.mulf %23, %24 : vector<16x128xf32>
    %26 = vector.broadcast %11 : vector<16x1xf32> to vector<16x128xf32>
    %27 = arith.subf %4, %26 : vector<16x128xf32>
    %28 = arith.mulf %27, %25 : vector<16x128xf32>
    %29 = vector.broadcast %19 : vector<1x128xf32> to vector<16x128xf32>
    %30 = arith.addf %28, %29 : vector<16x128xf32>
    %c0_12 = arith.constant 0 : index
    %c0_13 = arith.constant 0 : index
    %31 = vector.load %arg4[%c0_12, %c0_13] : memref<16x128xf32, #tpu.memory_space<vmem>>, vector<16x128xf32>
    tpu.vector_store %arg4[%c0_12, %c0_13], %30 {strides = array<i32>} : memref<16x128xf32, #tpu.memory_space<vmem>>, vector<16x128xf32>,
    return
  }
  func.func @transform_0(%arg0: i32) -> (i32, i32) {
    %c0_i32 = arith.constant 0 : i32
    %c0_i32_0 = arith.constant 0 : i32
    return %arg0, %c0_i32 : i32, i32
  }
  func.func @transform_1(%arg0: i32) -> (i32, i32) {
    %c0_i32 = arith.constant 0 : i32
    %c0_i32_0 = arith.constant 0 : i32
    return %arg0, %c0_i32 : i32, i32
  }
  func.func @transform_2(%arg0: i32) -> (i32, i32) {
    %c0_i32 = arith.constant 0 : i32
    %c0_i32_0 = arith.constant 0 : i32
    %c0_i32_1 = arith.constant 0 : i32
    return %c0_i32, %c0_i32_0 : i32, i32
  }
  func.func @transform_3(%arg0: i32) -> (i32, i32) {
    %c0_i32 = arith.constant 0 : i32
    %c0_i32_0 = arith.constant 0 : i32
    return %arg0, %c0_i32 : i32, i32
  }
}

</mosaic_0001>

<bundles_post_ra>
// kernel: tpu_custom_call.1
= control target key start
LH: loop header
LB: loop body
LE: loop exit
PB: predicated region body
PF: predicated region fallthrough
CT: control target
= control target key end

     0   :  { %8 = vsyncpa [#allocation3], 0  ;;  %s272_s0 = inlined_call_operand.hbm [shape: f32[16,128], index: 0, kind: input, shape index: {}]   ;;  %s273_s1 = inlined_call_operand.hbm [shape: f32[16,128], index: 1, kind: input, shape index: {}]   ;;  %s274_s2 = inlined_call_operand.vmem [shape: f32[2,128], index: 2, kind: input, shape index: {}]   ;;  %s275_s3 = inlined_call_operand.hbm [shape: f32[16,128], index: 3, kind: output, shape index: {}]  }
   0x1   :  { %9 = vsyncpa [#allocation6], 0 }
   0x2   :  { %10 = vsyncpa [#allocation4], 0  ;;  %s196_s12 = smov [#allocation2]   ;;  %s124_s16 = scalar_lea.hbm %s272_s0, 256 }
   0x3   :  { %s16_s13 = sshll.u32 %s196_s12, 4  ;;  %p125_p0 = scmp.ne.s32.totalorder %s272_s0, %s124_s16  ;;  %s17_s13 = int_to_ptr.vmem [resolvable:$true] %s16_s13 }
   0x4   :  { %p128_p1 = scmp.lt.u32.totalorder %s124_s16, %s272_s0 }
   0x6   :  { %p130_p2 = pnand %p128_p1, %p125_p0 }
   0x8   :  { %133 = shalt.err (!%p130_p2)
}
   0x9   :  { %s134_s21 = scalar_lea.vmem %s17_s13, 256  ;;  %p139_p4 = scmp.lt.s32.totalorder %s17_s13, %s17_s13 }
   0xa   :  { %p135_p3 = scmp.ne.s32.totalorder %s17_s13, %s134_s21  ;;  %p140_p5 = scmp.lt.s32.totalorder %s134_s21, %s134_s21 }
   0xc   :  { %p141_p6 = por %p140_p5, %p139_p4 }
   0xe   :  { %p142_p7 = pnand %p141_p6, %p135_p3 }
  0x10   :  { %145 = shalt.err (!%p142_p7)
}
  0x11   :  { %s197_s22 = smov 128   ;;  %s198_s23 = smov 8  }
  0x12   :  { %22 = dma.hbm_to_vmem [thread:$0]  %s272_s0, 256, %s17_s13, [#allocation3], %s197_s22, %s197_s22, %s198_s23  }
  0x13   :  { %s199_s26 = smov [#allocation5]   ;;  %s146_s30 = scalar_lea.hbm %s273_s1, 256 }
  0x14   :  { %s28_s27 = sshll.u32 %s199_s26, 4  ;;  %p147_p8 = scmp.ne.s32.totalorder %s273_s1, %s146_s30  ;;  %s29_s27 = int_to_ptr.vmem [resolvable:$true] %s28_s27 }
  0x15   :  { %p150_p9 = scmp.lt.u32.totalorder %s146_s30, %s273_s1 }
  0x17   :  { %p152_p10 = pnand %p150_p9, %p147_p8 }
  0x19   :  { %155 = shalt.err (!%p152_p10)
}
  0x1a   :  { %s156_s8 = scalar_lea.vmem %s29_s27, 256  ;;  %p161_p12 = scmp.lt.s32.totalorder %s29_s27, %s29_s27 }
  0x1b   :  { %p157_p11 = scmp.ne.s32.totalorder %s29_s27, %s156_s8  ;;  %p162_p13 = scmp.lt.s32.totalorder %s156_s8, %s156_s8 }
  0x1d   :  { %p163_p0 = por %p162_p13, %p161_p12 }
  0x1f   :  { %p164_p1 = pnand %p163_p0, %p157_p11 }
  0x21   :  { %167 = shalt.err (!%p164_p1)
}
  0x22   :  { %34 = dma.hbm_to_vmem [thread:$0]  %s273_s1, 256, %s29_s27, [#allocation6], %s197_s22, %s197_s22, %s198_s23  }
  0x23   :  { %190 = dma.done.wait [#allocation3], 256  }
  0x24   :  { %191 = vsyncadd [#allocation3], 4294967040 }
  0x25   :  { %192 = dma.done.wait [#allocation6], 256  }
  0x26   :  { %193 = vsyncadd [#allocation6], 4294967040  ;;  %v43_v0 = vld [vmem:[#allocation2] sm:$0xff]  ;;  %v45_v1 = vld [vmem:[#allocation5] sm:$0xff]  ;;  %s200_s13 = smov [#allocation7]  }
  0x27   :  { %v47_v2 = vmul.f32 2.0, %v45_v1  ;;  %v44_v3 = vld [vmem:[#allocation2 + $0x8] sm:$0xff]  ;;  %v46_v4 = vld [vmem:[#allocation5 + $0x8] sm:$0xff]  ;;  %v113_v26 = vld [vmem:[%s274_s2] ss:$0 sm:$0xff]  ;;  %s100_s14 = sshll.u32 %s200_s13, 4  ;;  %s101_s14 = int_to_ptr.vmem [resolvable:$true] %s100_s14 }
  0x28   :  { %v48_v5 = vmul.f32 2.0, %v46_v4  ;;  %v114_v30 = vld [vmem:[%s274_s2 + $0x1] ss:$0 sm:$0xff]  ;;  %s168_s15 = scalar_lea.vmem %s101_s14, 256  ;;  %p173_p3 = scmp.lt.s32.totalorder %s101_s14, %s101_s14 }
  0x29   :  { %v49_v6 = vadd.f32 %v47_v2, %v43_v0  ;;  %p169_p2 = scmp.ne.s32.totalorder %s101_s14, %s168_s15  ;;  %p174_p4 = scmp.lt.s32.totalorder %s168_s15, %s168_s15 }
  0x2a   :  { %v50_v7 = vadd.f32 %v48_v5, %v44_v3 }
  0x2b   :  { %51 = vadd.xlane.f32.xlu0 %v49_v6  ;;  %v55_v8 = vmul.f32 %v49_v6, %v49_v6  ;;  %p175_p5 = por %p174_p4, %p173_p3 }
  0x2c   :  { %v56_v9 = vmul.f32 %v50_v7, %v50_v7 }
  0x2d   :  { %57 = vadd.xlane.f32.xlu1 %v55_v8  ;;  %p176_p6 = pnand %p175_p5, %p169_p2 }
  0x2f   :  { %53 = vadd.xlane.f32.xlu0 %v50_v7 }
  0x31   :  { %59 = vadd.xlane.f32.xlu1 %v56_v9 }
  0xb8   :  { %v52_v10 = vpop.xlane.xlu0 %51 }
  0xb9   :  { %v61_v11 = vmul.f32 0.0078125, %v52_v10 }
  0xba   :  { %v58_v12 = vpop.xlane.xlu1 %57 }
  0xbb   :  { %v65_v13 = vmul.f32 %v61_v11, %v61_v11  ;;  %v63_v14 = vmul.f32 0.0078125, %v58_v12  ;;  %v83_v28 = vsub.f32 %v49_v6, %v61_v11 }
  0xbc   :  { %v54_v15 = vpop.xlane.xlu0 %53 }
  0xbd   :  { %v67_v16 = vsub.f32 %v63_v14, %v65_v13  ;;  %v62_v17 = vmul.f32 0.0078125, %v54_v15 }
  0xbe   :  { %v60_v18 = vpop.xlane.xlu1 %59 }
  0xbf   :  { %v69_v19 = vmax.f32 %v67_v16, 0.0  ;;  %v66_v20 = vmul.f32 %v62_v17, %v62_v17  ;;  %v64_v21 = vmul.f32 0.0078125, %v60_v18  ;;  %v84_v33 = vsub.f32 %v50_v7, %v62_v17 }
  0xc1   :  { %v73_v22 = vadd.f32 1e-05, %v69_v19  ;;  %v68_v23 = vsub.f32 %v64_v21, %v66_v20 }
  0xc3   :  { %120 = vrsqrt.f32 %v73_v22  ;;  %v70_v24 = vmax.f32 %v68_v23, 0.0 }
  0xc5   :  { %v74_v25 = vadd.f32 1e-05, %v70_v24 }
  0xc7   :  { %122 = vrsqrt.f32 %v74_v25 }
  0xcd   :  { %v121_v27 = vpop.eup %120 }
  0xce   :  { %v81_v29 = vmul.f32 %v121_v27, %v113_v26 }
  0xd0   :  { %v85_v31 = vmul.f32 %v83_v28, %v81_v29 }
  0xd1   :  { %v123_v32 = vpop.eup %122 }
  0xd2   :  { %v82_v34 = vmul.f32 %v123_v32, %v113_v26  ;;  %v91_v35 = vadd.f32 %v114_v30, %v85_v31 }
  0xd4   :  { %v86_v36 = vmul.f32 %v84_v33, %v82_v34  ;;  %93 = vst [vmem:[#allocation7] sm:$0xff] %v91_v35 }
  0xd6   :  { %v92_v37 = vadd.f32 %v114_v30, %v86_v36 }
  0xd8   :  { %94 = vst [vmem:[#allocation7 + $0x8] sm:$0xff] %v92_v37 }
  0xd9   :  { %179 = shalt.err (!%p176_p6)
}
  0xda   :  { %s180_s17 = scalar_lea.hbm %s275_s3, 256 }
  0xdb   :  { %p181_p7 = scmp.ne.s32.totalorder %s275_s3, %s180_s17  ;;  %p184_p8 = scmp.lt.u32.totalorder %s180_s17, %s275_s3 }
  0xdd   :  { %p186_p9 = pnand %p184_p8, %p181_p7 }
  0xdf   :  { %189 = shalt.err (!%p186_p9)
}
  0xe0   :  { %106 = dma.vmem_to_hbm [thread:$0]  %s101_s14, 256, %s275_s3, [#allocation4], %s197_s22, %s197_s22, %s198_s23  }
  0xe1   :  { %194 = dma.done.wait [#allocation4], 256  }
  0xe2   :  { %195 = vsyncadd [#allocation4], 4294967040 }
  0xe3   :  { %110 = vsyncpa [#allocation3], 1 }
  0xe4   :  { %111 = vsyncpa [#allocation6], 1 }
  0xe5   :  { %112 = vsyncpa [#allocation4], 1 }

</bundles_post_ra>
